<compile_context>
chip_gen: v7x
topology: tpu7x:2x2x1
jax: 0.10.0
libtpu: 0.0.40
codegen_flags: <defaults>
</compile_context>

<pallas_src>
import functools

import jax
import jax.numpy as jnp
from jax import lax
from jax.experimental import pallas as pl
from jax.experimental.pallas import tpu as pltpu


# ---------------------------------------------------------------------------
# Padding computation -- mirrors calc_padding from the PyTorch spec exactly.
# ---------------------------------------------------------------------------
def calc_padding(in_size, kernel_size, stride):
    if in_size[0] % stride[0] == 0:
        pad_along_height = max(kernel_size[0] - stride[0], 0)
    else:
        pad_along_height = max(kernel_size[0] - in_size[0] % stride[0], 0)
    if in_size[1] % stride[1] == 0:
        pad_along_width = max(kernel_size[1] - stride[1], 0)
    else:
        pad_along_width = max(kernel_size[1] - in_size[1] % stride[1], 0)
    pad_top = pad_along_height // 2
    pad_bottom = pad_along_height - pad_top
    pad_left = pad_along_width // 2
    pad_right = pad_along_width - pad_left
    return [pad_left, pad_right, pad_top, pad_bottom]


def _round_up(x, m):
    return ((x + m - 1) // m) * m


# ---------------------------------------------------------------------------
# Tiled GEMM + bias + ReLU Pallas kernel (conv core for all three branches).
# ---------------------------------------------------------------------------
def _gemm_bias_relu_kernel(x_ref, w_ref, b_ref, o_ref, acc_ref):
    k = pl.program_id(2)

    @pl.when(k == 0)
    def _init():
        acc_ref[...] = jnp.zeros_like(acc_ref)

    acc_ref[...] += jnp.dot(x_ref[...], w_ref[...],
                            preferred_element_type=jnp.float32)

    # Bias add + ReLU + downcast only once, in the finalize step (keeps the
    # VALU epilogue out of the reduction loop).
    @pl.when(k == pl.num_programs(2) - 1)
    def _finalize():
        y = acc_ref[...] + b_ref[...]
        o_ref[...] = jnp.maximum(y, 0.0).astype(o_ref.dtype)


def gemm_bias_relu(x, w, b, *, compute_dtype=jnp.bfloat16):
    """relu(x @ w + b) with f32 accumulation.  x:(M,K)  w:(K,N)  b:(N,) -> f32 (M,N)."""
    M, K = x.shape
    Kw, N = w.shape
    assert K == Kw and b.shape == (N,)

    # 128-wide tiles keep stores lane-dense and shapes MXU-friendly on v5e/v6e/v7x.
    # Small dims fall back to a single full-extent block (allowed by the (8,128) rule).
    tm = 128 if M >= 128 else _round_up(M, 16)
    tk = 128 if K >= 128 else _round_up(K, 16)
    tn = 128  # output last dim always a multiple of 128 -> unmasked vst

    M_pad = _round_up(M, tm)
    K_pad = _round_up(K, tk)
    N_pad = _round_up(N, tn)

    x_p = jnp.zeros((M_pad, K_pad), compute_dtype).at[:M, :K].set(
        x.astype(compute_dtype))
    w_p = jnp.zeros((K_pad, N_pad), compute_dtype).at[:K, :N].set(
        w.astype(compute_dtype))
    b_p = jnp.zeros((1, N_pad), jnp.float32).at[0, :N].set(
        b.astype(jnp.float32))

    grid = (M_pad // tm, N_pad // tn, K_pad // tk)

    out = pl.pallas_call(
        _gemm_bias_relu_kernel,
        out_shape=jax.ShapeDtypeStruct((M_pad, N_pad), jnp.float32),
        grid_spec=pltpu.PrefetchScalarGridSpec(
            num_scalar_prefetch=0,
            grid=grid,
            in_specs=[
                pl.BlockSpec((tm, tk), lambda i, j, k: (i, k)),
                pl.BlockSpec((tk, tn), lambda i, j, k: (k, j)),
                pl.BlockSpec((1, tn), lambda i, j, k: (0, j)),  # resident across k
            ],
            out_specs=pl.BlockSpec((tm, tn), lambda i, j, k: (i, j)),
            scratch_shapes=[pltpu.VMEM((tm, tn), jnp.float32)],
        ),
        compiler_params=pltpu.CompilerParams(
            # Output tiles are independent -> "parallel" (megacore sharding on v7x);
            # K reduction axis last and "arbitrary" for the accumulator pattern.
            dimension_semantics=("parallel", "parallel", "arbitrary"),
        ),
    )(x_p, w_p, b_p)
    return out[:M, :N]


def gemm_bias_relu_ref(x, w, b, *, compute_dtype=jnp.bfloat16):
    """Precision-matched plain-XLA reference for the Pallas GEMM."""
    y = jnp.dot(x.astype(compute_dtype), w.astype(compute_dtype),
                preferred_element_type=jnp.float32) + b[None, :].astype(jnp.float32)
    return jnp.maximum(y, 0.0)


# ---------------------------------------------------------------------------
# Parameter preparation: fold eval-mode BN into each conv ONCE and lay the
# weight out as (K, N) so the kernel never transposes per call.
# ---------------------------------------------------------------------------
def _fold_bn(conv_w, gamma, beta, mean, var, eps=1e-3):
    scale = gamma / jnp.sqrt(var + eps)                       # (C_out,)
    w = conv_w * scale[:, None, None, None]                   # (C_out, C_in, kh, kw)
    bias = beta - mean * scale                                # (C_out,)
    c_out = conv_w.shape[0]
    w2d = w.reshape(c_out, -1).T                              # (C_in*kh*kw, C_out)
    return w2d, bias


def prepare_params(raw, eps=1e-3):
    w1, b1 = _fold_bn(raw['conv1_w'], raw['bn1_g'], raw['bn1_b'],
                      raw['bn1_m'], raw['bn1_v'], eps)
    w2, b2 = _fold_bn(raw['conv2_w'], raw['bn2_g'], raw['bn2_b'],
                      raw['bn2_m'], raw['bn2_v'], eps)
    w3, b3 = _fold_bn(raw['conv3_w'], raw['bn3_g'], raw['bn3_b'],
                      raw['bn3_m'], raw['bn3_v'], eps)
    return dict(w1=w1, b1=b1, w2=w2, b2=b2, w3=w3, b3=b3)


# ---------------------------------------------------------------------------
# Layout glue (plain JAX): replication pad + 1-D im2col in NHWC.
# ---------------------------------------------------------------------------
def _replication_pad_nhwc(x, padding):
    left, right, top, bottom = padding
    return jnp.pad(x, ((0, 0), (top, bottom), (left, right), (0, 0)), mode='edge')


def _im2col_width(x_nhwc, kw, sw):
    B, H, Wp, C = x_nhwc.shape
    w_out = (Wp - kw) // sw + 1
    taps = [x_nhwc[:, :, t:t + sw * (w_out - 1) + 1:sw, :] for t in range(kw)]
    p = jnp.stack(taps, axis=-1)                              # (B,H,Wout,C,kw): (ci, tap) order
    return p.reshape(B, H, w_out, C * kw), w_out


def _im2col_height(x_nhwc, kh, sh):
    B, Hp, W, C = x_nhwc.shape
    h_out = (Hp - kh) // sh + 1
    taps = [x_nhwc[:, t:t + sh * (h_out - 1) + 1:sh, :, :] for t in range(kh)]
    p = jnp.stack(taps, axis=-1)                              # (B,Hout,W,C,kh): (ci, tap) order
    return p.reshape(B, h_out, W, C * kh), h_out


# ---------------------------------------------------------------------------
# Forward pass of InceptionBranchAsynchFactorization (eval-mode BN folded).
# ---------------------------------------------------------------------------
def inception_branch_forward(x_nchw, params, *, kernel_size, stride,
                             gemm_fn=gemm_bias_relu):
    B, C_in, H, W = x_nchw.shape
    kh, kw = kernel_size
    sh, sw = stride

    # NHWC keeps channels on the lane (last) dim for every GEMM stage.
    x = jnp.transpose(x_nchw, (0, 2, 3, 1))                   # (B, H, W, C_in)

    # ---- branch_1: 1x1 conv + BN + ReLU == channel GEMM ----
    w1, b1 = params['w1'], params['b1']
    C1 = w1.shape[1]
    y = gemm_fn(x.reshape(B * H * W, C_in), w1, b1).reshape(B, H, W, C1)

    # ---- same_padding_1 (ReplicationPad2d) + branch_2: (1, kw) conv ----
    pad1 = calc_padding([H, W], (1, kw), (1, sw))
    y = _replication_pad_nhwc(y, pad1)
    patches, W2 = _im2col_width(y, kw, sw)
    H2 = patches.shape[1]
    y = gemm_fn(patches.reshape(B * H2 * W2, C1 * kw),
                params['w2'], params['b2']).reshape(B, H2, W2, C1)

    # ---- same_padding_2 (ReplicationPad2d) + branch_3: (kh, 1) conv ----
    pad2 = calc_padding([H, W], (kh, 1), (sh, 1))
    y = _replication_pad_nhwc(y, pad2)
    patches, H3 = _im2col_height(y, kh, sh)
    W3 = patches.shape[2]
    y = gemm_fn(patches.reshape(B * H3 * W3, C1 * kh),
                params['w3'], params['b3']).reshape(B, H3, W3, C1)

    return jnp.transpose(y, (0, 3, 1, 2))                     # back to NCHW


# ---------------------------------------------------------------------------
# Full-f32 reference replicating the PyTorch module (eval-mode BN).
# ---------------------------------------------------------------------------
def _conv_bn_relu_ref(x_nchw, conv_w, gamma, beta, mean, var, stride, eps=1e-3):
    y = lax.conv_general_dilated(
        x_nchw, conv_w, window_strides=stride, padding='VALID',
        dimension_numbers=('NCHW', 'OIHW', 'NCHW'))
    scale = gamma / jnp.sqrt(var + eps)
    y = y * scale[None, :, None, None] + (beta - mean * scale)[None, :, None, None]
    return jnp.maximum(y, 0.0)


def reference_forward_f32(x_nchw, raw, kernel_size, stride):
    kh, kw = kernel_size
    sh, sw = stride
    _, _, H, W = x_nchw.shape
    y = _conv_bn_relu_ref(x_nchw, raw['conv1_w'], raw['bn1_g'], raw['bn1_b'],
                          raw['bn1_m'], raw['bn1_v'], (1, 1))
    p = calc_padding([H, W], (1, kw), (1, sw))
    y = jnp.pad(y, ((0, 0), (0, 0), (p[2], p[3]), (p[0], p[1])), mode='edge')
    y = _conv_bn_relu_ref(y, raw['conv2_w'], raw['bn2_g'], raw['bn2_b'],
                          raw['bn2_m'], raw['bn2_v'], (1, sw))
    p = calc_padding([H, W], (kh, 1), (sh, 1))
    y = jnp.pad(y, ((0, 0), (0, 0), (p[2], p[3]), (p[0], p[1])), mode='edge')
    y = _conv_bn_relu_ref(y, raw['conv3_w'], raw['bn3_g'], raw['bn3_b'],
                          raw['bn3_m'], raw['bn3_v'], (sh, 1))
    return y


if __name__ == "__main__":
    key = jax.random.PRNGKey(0)
    ks = jax.random.split(key, 8)

    # Small shapes consistent with the module.
    B, C_in, H, W = 2, 4, 16, 16
    C_out = 32
    kernel_size = (3, 3)
    stride = (1, 1)

    x = jax.random.normal(ks[0], (B, C_in, H, W), dtype=jnp.float32)

    def conv_init(k, shape):
        fan_in = shape[1] * shape[2] * shape[3]
        bound = 1.0 / (fan_in ** 0.5)
        return jax.random.uniform(k, shape, minval=-bound, maxval=bound,
                                  dtype=jnp.float32)

    raw = dict(
        conv1_w=conv_init(ks[1], (C_out, C_in, 1, 1)),
        conv2_w=conv_init(ks[2], (C_out, C_out, 1, kernel_size[1])),
        conv3_w=conv_init(ks[3], (C_out, C_out, kernel_size[0], 1)),
    )
    for i, name in enumerate(('bn1', 'bn2', 'bn3')):
        kg, kb, km, kv = jax.random.split(ks[4 + i], 4)
        raw[f'{name}_g'] = jax.random.uniform(kg, (C_out,), minval=0.5,
                                              maxval=1.5, dtype=jnp.float32)
        raw[f'{name}_b'] = 0.1 * jax.random.normal(kb, (C_out,), dtype=jnp.float32)
        raw[f'{name}_m'] = 0.1 * jax.random.normal(km, (C_out,), dtype=jnp.float32)
        raw[f'{name}_v'] = jax.random.uniform(kv, (C_out,), minval=0.5,
                                              maxval=1.5, dtype=jnp.float32)

    # BN folded + (K, N) weight layout once, up front.
    params = prepare_params(raw)

    fwd = jax.jit(functools.partial(inception_branch_forward,
                                    kernel_size=kernel_size, stride=stride))
    y = fwd(x, params)
    jax.block_until_ready(y)

    # 1) Precision-matched reference (same bf16 operand rounding, plain XLA dot).
    y_matched = inception_branch_forward(x, params, kernel_size=kernel_size,
                                         stride=stride, gemm_fn=gemm_bias_relu_ref)
    # 2) Full-f32 reference reproducing the PyTorch module's convs / BN / pads.
    y_f32 = reference_forward_f32(x, raw, kernel_size, stride)

    assert y.shape == (B, C_out, H, W), y.shape
    assert jnp.allclose(y, y_matched, atol=5e-3, rtol=5e-3), "mismatch vs matched reference"
    assert jnp.allclose(y, y_f32, atol=1e-1, rtol=1e-1), "mismatch vs f32 reference"

    print("KERNEL_OK")
</pallas_src>

<mosaic_0001>
module attributes {stable_mosaic.version = 11 : i64} {
  func.func @_gemm_bias_relu_kernel(%arg0: i32, %arg1: i32, %arg2: i32, %arg3: memref<128x16xbf16, #tpu.memory_space<vmem>>, %arg4: memref<16x128xbf16, #tpu.memory_space<vmem>>, %arg5: memref<1x128xf32, #tpu.memory_space<vmem>>, %arg6: memref<128x128xf32, #tpu.memory_space<vmem>>, %arg7: memref<128x128xf32, #tpu.memory_space<vmem>>) attributes {dimension_semantics = [#tpu.dimension_semantics<parallel>, #tpu.dimension_semantics<parallel>, #tpu.dimension_semantics<arbitrary>], iteration_bounds = array<i64: 4, 1, 1>, scalar_prefetch = 0 : i64, scratch_operands = 1 : i64, tpu.core_type = #tpu.core_type<tc>, window_params = [{transform_indices = @transform_0, window_bounds = array<i64: 128, 16>}, {transform_indices = @transform_1, window_bounds = array<i64: 16, 128>}, {transform_indices = @transform_2, window_bounds = array<i64: 1, 128>}, {transform_indices = @transform_3, window_bounds = array<i64: 128, 128>}]} {
    %c0_i32 = arith.constant 0 : i32
    %0 = arith.cmpi eq, %arg2, %c0_i32 : i32
    %1 = arith.extui %0 : i1 to i32
    %c0_i32_0 = arith.constant 0 : i32
    %2 = arith.cmpi ne, %1, %c0_i32_0 : i32
    scf.if %2 {
      %cst_10 = arith.constant 0.000000e+00 : f32
      %12 = vector.broadcast %cst_10 : f32 to vector<128x128xf32>
      %c0_11 = arith.constant 0 : index
      %c0_12 = arith.constant 0 : index
      %13 = vector.load %arg7[%c0_11, %c0_12] : memref<128x128xf32, #tpu.memory_space<vmem>>, vector<128x128xf32>
      tpu.vector_store %arg7[%c0_11, %c0_12], %12 {strides = array<i32>} : memref<128x128xf32, #tpu.memory_space<vmem>>, vector<128x128xf32>,
    } else {
    }
    %c0 = arith.constant 0 : index
    %c0_1 = arith.constant 0 : index
    %3 = vector.load %arg7[%c0, %c0_1] : memref<128x128xf32, #tpu.memory_space<vmem>>, vector<128x128xf32>
    %c0_2 = arith.constant 0 : index
    %c0_3 = arith.constant 0 : index
    %4 = vector.load %arg3[%c0_2, %c0_3] : memref<128x16xbf16, #tpu.memory_space<vmem>>, vector<128x16xbf16>
    %c0_4 = arith.constant 0 : index
    %c0_5 = arith.constant 0 : index
    %5 = vector.load %arg4[%c0_4, %c0_5] : memref<16x128xbf16, #tpu.memory_space<vmem>>, vector<16x128xbf16>
    %cst = arith.constant dense<0.000000e+00> : vector<128x128xf32>
    %6 = tpu.matmul %4, %5, %cst {dimension_numbers = #tpu.dot_dimension_numbers<[1], [0], [0], [1], [0, 0, 1, 1], [], []>} : vector<128x16xbf16>, vector<16x128xbf16>, vector<128x128xf32> -> vector<128x128xf32>
    %7 = arith.addf %3, %6 : vector<128x128xf32>
    %c0_6 = arith.constant 0 : index
    %c0_7 = arith.constant 0 : index
    %8 = vector.load %arg7[%c0_6, %c0_7] : memref<128x128xf32, #tpu.memory_space<vmem>>, vector<128x128xf32>
    tpu.vector_store %arg7[%c0_6, %c0_7], %7 {strides = array<i32>} : memref<128x128xf32, #tpu.memory_space<vmem>>, vector<128x128xf32>,
    %c0_i32_8 = arith.constant 0 : i32
    %9 = arith.cmpi eq, %arg2, %c0_i32_8 : i32
    %10 = arith.extui %9 : i1 to i32
    %c0_i32_9 = arith.constant 0 : i32
    %11 = arith.cmpi ne, %10, %c0_i32_9 : i32
    scf.if %11 {
      %c0_10 = arith.constant 0 : index
      %c0_11 = arith.constant 0 : index
      %12 = vector.load %arg7[%c0_10, %c0_11] : memref<128x128xf32, #tpu.memory_space<vmem>>, vector<128x128xf32>
      %c0_12 = arith.constant 0 : index
      %c0_13 = arith.constant 0 : index
      %13 = vector.load %arg5[%c0_12, %c0_13] : memref<1x128xf32, #tpu.memory_space<vmem>>, vector<1x128xf32>
      %14 = vector.broadcast %13 : vector<1x128xf32> to vector<128x128xf32>
      %15 = arith.addf %12, %14 : vector<128x128xf32>
      %cst_14 = arith.constant 0.000000e+00 : f32
      %16 = vector.broadcast %cst_14 : f32 to vector<128x128xf32>
      %17 = arith.maximumf %15, %16 : vector<128x128xf32>
      %c0_15 = arith.constant 0 : index
      %c0_16 = arith.constant 0 : index
      %18 = vector.load %arg6[%c0_15, %c0_16] : memref<128x128xf32, #tpu.memory_space<vmem>>, vector<128x128xf32>
      tpu.vector_store %arg6[%c0_15, %c0_16], %17 {strides = array<i32>} : memref<128x128xf32, #tpu.memory_space<vmem>>, vector<128x128xf32>,
    } else {
    }
    return
  }
  func.func @transform_0(%arg0: i32, %arg1: i32, %arg2: i32) -> (i32, i32) {
    %c0_i32 = arith.constant 0 : i32
    return %arg0, %arg2 : i32, i32
  }
  func.func @transform_1(%arg0: i32, %arg1: i32, %arg2: i32) -> (i32, i32) {
    %c0_i32 = arith.constant 0 : i32
    return %arg2, %arg1 : i32, i32
  }
  func.func @transform_2(%arg0: i32, %arg1: i32, %arg2: i32) -> (i32, i32) {
    %c0_i32 = arith.constant 0 : i32
    %c0_i32_0 = arith.constant 0 : i32
    return %c0_i32, %arg1 : i32, i32
  }
  func.func @transform_3(%arg0: i32, %arg1: i32, %arg2: i32) -> (i32, i32) {
    %c0_i32 = arith.constant 0 : i32
    return %arg0, %arg1 : i32, i32
  }
}

module attributes {stable_mosaic.version = 11 : i64} {
  func.func @_gemm_bias_relu_kernel(%arg0: i32, %arg1: i32, %arg2: i32, %arg3: memref<128x96xbf16, #tpu.memory_space<vmem>>, %arg4: memref<96x128xbf16, #tpu.memory_space<vmem>>, %arg5: memref<1x128xf32, #tpu.memory_space<vmem>>, %arg6: memref<128x128xf32, #tpu.memory_space<vmem>>, %arg7: memref<128x128xf32, #tpu.memory_space<vmem>>) attributes {dimension_semantics = [#tpu.dimension_semantics<parallel>, #tpu.dimension_semantics<parallel>, #tpu.dimension_semantics<arbitrary>], iteration_bounds = array<i64: 4, 1, 1>, scalar_prefetch = 0 : i64, scratch_operands = 1 : i64, tpu.core_type = #tpu.core_type<tc>, window_params = [{transform_indices = @transform_0, window_bounds = array<i64: 128, 96>}, {transform_indices = @transform_1, window_bounds = array<i64: 96, 128>}, {transform_indices = @transform_2, window_bounds = array<i64: 1, 128>}, {transform_indices = @transform_3, window_bounds = array<i64: 128, 128>}]} {
    %c0_i32 = arith.constant 0 : i32
    %0 = arith.cmpi eq, %arg2, %c0_i32 : i32
    %1 = arith.extui %0 : i1 to i32
    %c0_i32_0 = arith.constant 0 : i32
    %2 = arith.cmpi ne, %1, %c0_i32_0 : i32
    scf.if %2 {
      %cst_10 = arith.constant 0.000000e+00 : f32
      %12 = vector.broadcast %cst_10 : f32 to vector<128x128xf32>
      %c0_11 = arith.constant 0 : index
      %c0_12 = arith.constant 0 : index
      %13 = vector.load %arg7[%c0_11, %c0_12] : memref<128x128xf32, #tpu.memory_space<vmem>>, vector<128x128xf32>
      tpu.vector_store %arg7[%c0_11, %c0_12], %12 {strides = array<i32>} : memref<128x128xf32, #tpu.memory_space<vmem>>, vector<128x128xf32>,
    } else {
    }
    %c0 = arith.constant 0 : index
    %c0_1 = arith.constant 0 : index
    %3 = vector.load %arg7[%c0, %c0_1] : memref<128x128xf32, #tpu.memory_space<vmem>>, vector<128x128xf32>
    %c0_2 = arith.constant 0 : index
    %c0_3 = arith.constant 0 : index
    %4 = vector.load %arg3[%c0_2, %c0_3] : memref<128x96xbf16, #tpu.memory_space<vmem>>, vector<128x96xbf16>
    %c0_4 = arith.constant 0 : index
    %c0_5 = arith.constant 0 : index
    %5 = vector.load %arg4[%c0_4, %c0_5] : memref<96x128xbf16, #tpu.memory_space<vmem>>, vector<96x128xbf16>
    %cst = arith.constant dense<0.000000e+00> : vector<128x128xf32>
    %6 = tpu.matmul %4, %5, %cst {dimension_numbers = #tpu.dot_dimension_numbers<[1], [0], [0], [1], [0, 0, 1, 1], [], []>} : vector<128x96xbf16>, vector<96x128xbf16>, vector<128x128xf32> -> vector<128x128xf32>
    %7 = arith.addf %3, %6 : vector<128x128xf32>
    %c0_6 = arith.constant 0 : index
    %c0_7 = arith.constant 0 : index
    %8 = vector.load %arg7[%c0_6, %c0_7] : memref<128x128xf32, #tpu.memory_space<vmem>>, vector<128x128xf32>
    tpu.vector_store %arg7[%c0_6, %c0_7], %7 {strides = array<i32>} : memref<128x128xf32, #tpu.memory_space<vmem>>, vector<128x128xf32>,
    %c0_i32_8 = arith.constant 0 : i32
    %9 = arith.cmpi eq, %arg2, %c0_i32_8 : i32
    %10 = arith.extui %9 : i1 to i32
    %c0_i32_9 = arith.constant 0 : i32
    %11 = arith.cmpi ne, %10, %c0_i32_9 : i32
    scf.if %11 {
      %c0_10 = arith.constant 0 : index
      %c0_11 = arith.constant 0 : index
      %12 = vector.load %arg7[%c0_10, %c0_11] : memref<128x128xf32, #tpu.memory_space<vmem>>, vector<128x128xf32>
      %c0_12 = arith.constant 0 : index
      %c0_13 = arith.constant 0 : index
      %13 = vector.load %arg5[%c0_12, %c0_13] : memref<1x128xf32, #tpu.memory_space<vmem>>, vector<1x128xf32>
      %14 = vector.broadcast %13 : vector<1x128xf32> to vector<128x128xf32>
      %15 = arith.addf %12, %14 : vector<128x128xf32>
      %cst_14 = arith.constant 0.000000e+00 : f32
      %16 = vector.broadcast %cst_14 : f32 to vector<128x128xf32>
      %17 = arith.maximumf %15, %16 : vector<128x128xf32>
      %c0_15 = arith.constant 0 : index
      %c0_16 = arith.constant 0 : index
      %18 = vector.load %arg6[%c0_15, %c0_16] : memref<128x128xf32, #tpu.memory_space<vmem>>, vector<128x128xf32>
      tpu.vector_store %arg6[%c0_15, %c0_16], %17 {strides = array<i32>} : memref<128x128xf32, #tpu.memory_space<vmem>>, vector<128x128xf32>,
    } else {
    }
    return
  }
  func.func @transform_0(%arg0: i32, %arg1: i32, %arg2: i32) -> (i32, i32) {
    %c0_i32 = arith.constant 0 : i32
    return %arg0, %arg2 : i32, i32
  }
  func.func @transform_1(%arg0: i32, %arg1: i32, %arg2: i32) -> (i32, i32) {
    %c0_i32 = arith.constant 0 : i32
    return %arg2, %arg1 : i32, i32
  }
  func.func @transform_2(%arg0: i32, %arg1: i32, %arg2: i32) -> (i32, i32) {
    %c0_i32 = arith.constant 0 : i32
    %c0_i32_0 = arith.constant 0 : i32
    return %c0_i32, %arg1 : i32, i32
  }
  func.func @transform_3(%arg0: i32, %arg1: i32, %arg2: i32) -> (i32, i32) {
    %c0_i32 = arith.constant 0 : i32
    return %arg0, %arg1 : i32, i32
  }
}

module attributes {stable_mosaic.version = 11 : i64} {
  func.func @_gemm_bias_relu_kernel(%arg0: i32, %arg1: i32, %arg2: i32, %arg3: memref<128x96xbf16, #tpu.memory_space<vmem>>, %arg4: memref<96x128xbf16, #tpu.memory_space<vmem>>, %arg5: memref<1x128xf32, #tpu.memory_space<vmem>>, %arg6: memref<128x128xf32, #tpu.memory_space<vmem>>, %arg7: memref<128x128xf32, #tpu.memory_space<vmem>>) attributes {dimension_semantics = [#tpu.dimension_semantics<parallel>, #tpu.dimension_semantics<parallel>, #tpu.dimension_semantics<arbitrary>], iteration_bounds = array<i64: 4, 1, 1>, scalar_prefetch = 0 : i64, scratch_operands = 1 : i64, tpu.core_type = #tpu.core_type<tc>, window_params = [{transform_indices = @transform_0, window_bounds = array<i64: 128, 96>}, {transform_indices = @transform_1, window_bounds = array<i64: 96, 128>}, {transform_indices = @transform_2, window_bounds = array<i64: 1, 128>}, {transform_indices = @transform_3, window_bounds = array<i64: 128, 128>}]} {
    %c0_i32 = arith.constant 0 : i32
    %0 = arith.cmpi eq, %arg2, %c0_i32 : i32
    %1 = arith.extui %0 : i1 to i32
    %c0_i32_0 = arith.constant 0 : i32
    %2 = arith.cmpi ne, %1, %c0_i32_0 : i32
    scf.if %2 {
      %cst_10 = arith.constant 0.000000e+00 : f32
      %12 = vector.broadcast %cst_10 : f32 to vector<128x128xf32>
      %c0_11 = arith.constant 0 : index
      %c0_12 = arith.constant 0 : index
      %13 = vector.load %arg7[%c0_11, %c0_12] : memref<128x128xf32, #tpu.memory_space<vmem>>, vector<128x128xf32>
      tpu.vector_store %arg7[%c0_11, %c0_12], %12 {strides = array<i32>} : memref<128x128xf32, #tpu.memory_space<vmem>>, vector<128x128xf32>,
    } else {
    }
    %c0 = arith.constant 0 : index
    %c0_1 = arith.constant 0 : index
    %3 = vector.load %arg7[%c0, %c0_1] : memref<128x128xf32, #tpu.memory_space<vmem>>, vector<128x128xf32>
    %c0_2 = arith.constant 0 : index
    %c0_3 = arith.constant 0 : index
    %4 = vector.load %arg3[%c0_2, %c0_3] : memref<128x96xbf16, #tpu.memory_space<vmem>>, vector<128x96xbf16>
    %c0_4 = arith.constant 0 : index
    %c0_5 = arith.constant 0 : index
    %5 = vector.load %arg4[%c0_4, %c0_5] : memref<96x128xbf16, #tpu.memory_space<vmem>>, vector<96x128xbf16>
    %cst = arith.constant dense<0.000000e+00> : vector<128x128xf32>
    %6 = tpu.matmul %4, %5, %cst {dimension_numbers = #tpu.dot_dimension_numbers<[1], [0], [0], [1], [0, 0, 1, 1], [], []>} : vector<128x96xbf16>, vector<96x128xbf16>, vector<128x128xf32> -> vector<128x128xf32>
    %7 = arith.addf %3, %6 : vector<128x128xf32>
    %c0_6 = arith.constant 0 : index
    %c0_7 = arith.constant 0 : index
    %8 = vector.load %arg7[%c0_6, %c0_7] : memref<128x128xf32, #tpu.memory_space<vmem>>, vector<128x128xf32>
    tpu.vector_store %arg7[%c0_6, %c0_7], %7 {strides = array<i32>} : memref<128x128xf32, #tpu.memory_space<vmem>>, vector<128x128xf32>,
    %c0_i32_8 = arith.constant 0 : i32
    %9 = arith.cmpi eq, %arg2, %c0_i32_8 : i32
    %10 = arith.extui %9 : i1 to i32
    %c0_i32_9 = arith.constant 0 : i32
    %11 = arith.cmpi ne, %10, %c0_i32_9 : i32
    scf.if %11 {
      %c0_10 = arith.constant 0 : index
      %c0_11 = arith.constant 0 : index
      %12 = vector.load %arg7[%c0_10, %c0_11] : memref<128x128xf32, #tpu.memory_space<vmem>>, vector<128x128xf32>
      %c0_12 = arith.constant 0 : index
      %c0_13 = arith.constant 0 : index
      %13 = vector.load %arg5[%c0_12, %c0_13] : memref<1x128xf32, #tpu.memory_space<vmem>>, vector<1x128xf32>
      %14 = vector.broadcast %13 : vector<1x128xf32> to vector<128x128xf32>
      %15 = arith.addf %12, %14 : vector<128x128xf32>
      %cst_14 = arith.constant 0.000000e+00 : f32
      %16 = vector.broadcast %cst_14 : f32 to vector<128x128xf32>
      %17 = arith.maximumf %15, %16 : vector<128x128xf32>
      %c0_15 = arith.constant 0 : index
      %c0_16 = arith.constant 0 : index
      %18 = vector.load %arg6[%c0_15, %c0_16] : memref<128x128xf32, #tpu.memory_space<vmem>>, vector<128x128xf32>
      tpu.vector_store %arg6[%c0_15, %c0_16], %17 {strides = array<i32>} : memref<128x128xf32, #tpu.memory_space<vmem>>, vector<128x128xf32>,
    } else {
    }
    return
  }
  func.func @transform_0(%arg0: i32, %arg1: i32, %arg2: i32) -> (i32, i32) {
    %c0_i32 = arith.constant 0 : i32
    return %arg0, %arg2 : i32, i32
  }
  func.func @transform_1(%arg0: i32, %arg1: i32, %arg2: i32) -> (i32, i32) {
    %c0_i32 = arith.constant 0 : i32
    return %arg2, %arg1 : i32, i32
  }
  func.func @transform_2(%arg0: i32, %arg1: i32, %arg2: i32) -> (i32, i32) {
    %c0_i32 = arith.constant 0 : i32
    %c0_i32_0 = arith.constant 0 : i32
    return %c0_i32, %arg1 : i32, i32
  }
  func.func @transform_3(%arg0: i32, %arg1: i32, %arg2: i32) -> (i32, i32) {
    %c0_i32 = arith.constant 0 : i32
    return %arg0, %arg1 : i32, i32
  }
}

</mosaic_0001>

<bundles_post_ra>
// kernel: inception_branch_forward.3
= control target key start
LH: loop header
LB: loop body
LE: loop exit
PB: predicated region body
PF: predicated region fallthrough
CT: control target
= control target key end

     0   :  { %s836_s12 = smov 0   ;;  %s838_s13 = smov 0   ;;  %s901_s0 = inlined_call_operand.vmem [shape: bf16[512,16], index: 0, kind: input, shape index: {}]   ;;  %s902_s1 = inlined_call_operand.vmem [shape: bf16[16,128], index: 1, kind: input, shape index: {}]   ;;  %s903_s2 = inlined_call_operand.vmem [shape: f32[1,128], index: 2, kind: input, shape index: {}]   ;;  %s904_s3 = inlined_call_operand.vmem [shape: f32[512,128], index: 3, kind: output, shape index: {}]  }
   0x1   :  { %s840_s14 = smov 0  }
   0x2 LB: > { %s32_s15 = sadd.s32 1, %s810_s13  ;;  %p705_p0 = scmp.ge.s32.totalorder %s814_s14, 1  ;;  %s814_s14 = sphi %s840_s14, %s13_s14   ;;  %s810_s13 = sphi %s838_s13, %s906_s13   ;;  %s806_s12 = sphi %s836_s12, %s905_s12  }
   0x3   : > { %p34_p1 = scmp.ge.s32.totalorder %s32_s15, 4  ;;  %p188_p2 = scmp.lt.s32.totalorder %s814_s14, 5 }
   0x5   : > { %s908_s15 = smov (%p34_p1, %s32_s15), 0  ;;  %p189_p3 = pnand %p705_p0, %p188_p2 }
   0x6   : > { %v783_v0 = vld [vmem:[%s902_s1] sm:$0xff] (!%p189_p3)   ;;  %s706_s18 = sshll.u32 (!%p189_p3), %s806_s12, 4  ;;  %vm360_vm0 = vcmask (!%p189_p3), 130048  }
   0x7   : > { %192 = sbr.rel (%p189_p3) target bundleno = 248 (0xf8), region = 32  ;;  %p230_p4 = scmp.lt.s32.totalorder (!%p189_p3), %s706_s18, 63  ;;  %739 = vmatprep.subr.bf16.mxu0 (!%p189_p3), %v783_v0  ;;  %757 = vmatprep.subr.bf16.mxu1 (!%p189_p3), %v783_v0  ;;  %v727_v9 = vld [vmem:[%s903_s2] ss:$0 sm:$0xff] (!%p189_p3) }
   0x8   : > { %740 = vmatpush3.bf16.msra.mxu0 (!%p189_p3), %v783_v0  ;;  %758 = vmatpush3.bf16.msra.mxu1 (!%p189_p3), %v783_v0 }
   0xe   : > { %s910_s18 = smov (!%p230_p4, %s706_s18), 63 }
   0xf   : > { %s707_s19 = sshll.u32 %s910_s18, 2  ;;  %s709_s25 = sshll.u32 %s910_s18, 3 }
  0x10   : > { %s236_s22 = scalar_lea.vmem %s901_s0, %s707_s19  ;;  %s874_s28 = scalar_lea.vmem %s904_s3, %s709_s25 }
  0x11   : > { %v784_v1 = vld [vmem:[%s236_s22] sm:$0xff]   ;;  %v786_v3 = vld [vmem:[%s236_s22 + $0x8] sm:$0xff]   ;;  %v788_v5 = vld [vmem:[%s236_s22 + $0x10] sm:$0xff]  }
  0x12   : > { %v785_v2 = vld [vmem:[%s236_s22 + $0x20] sm:$0xff]   ;;  %741 = vmatprep.mubr.msk.bf16.mxu0 %vm360_vm0, %v784_v1  ;;  %v787_v4 = vld [vmem:[%s236_s22 + $0x28] sm:$0xff]   ;;  %v789_v6 = vld [vmem:[%s236_s22 + $0x30] sm:$0xff]  }
  0x13   : > { %749 = vmatprep.mubr.msk.bf16.mxu1 %vm360_vm0, %v785_v2  ;;  %742 = vmatmul.mubr.msk.bf16.vlgmr.msra.gmra.mrb[0].mxu0 %vm360_vm0, %v786_v3  ;;  %v790_v7 = vld [vmem:[%s236_s22 + $0x18] sm:$0xff]  }
  0x14   : > { %750 = vmatmul.mubr.msk.bf16.vlgmr.msra.gmra.mrb[0].mxu1 %vm360_vm0, %v787_v4  ;;  %745 = vmatprep.mubr.msk.bf16.mxu0 %vm360_vm0, %v788_v5  ;;  %v791_v8 = vld [vmem:[%s236_s22 + $0x38] sm:$0xff]  }
  0x15   : > { %753 = vmatprep.mubr.msk.bf16.mxu1 %vm360_vm0, %v789_v6 }
  0x1b   : > { %746 = vmatmul.mubr.msk.bf16.gmra.mrb[4].mxu0 %vm360_vm0, %v790_v7 }
  0x1c   : > { %754 = vmatmul.mubr.msk.bf16.gmra.mrb[4].mxu1 %vm360_vm0, %v791_v8 }
  0xe6   : > { %v743_v10 = vpop.f32.mrb[0].mxu0 }
  0xe7   : > { %v542_v11 = vadd.f32 %v743_v10, %v727_v9  ;;  %v751_v12 = vpop.f32.mrb[0].mxu1  ;;  %v419_v13 = vpop.f32.mrb[1].mxu0 }
  0xe8   : > { %v550_v14 = vadd.f32 %v751_v12, %v727_v9  ;;  %v540_v15 = vadd.f32 %v727_v9, %v419_v13  ;;  %v451_v16 = vpop.f32.mrb[1].mxu1  ;;  %v744_v17 = vpop.f32.mrb[2].mxu0 }
  0xe9   : > { %v558_v18 = vmax.f32 %v542_v11, 0.0  ;;  %v548_v19 = vadd.f32 %v727_v9, %v451_v16  ;;  %v543_v20 = vadd.f32 %v744_v17, %v727_v9  ;;  %v752_v21 = vpop.f32.mrb[2].mxu1  ;;  %v422_v22 = vpop.f32.mrb[3].mxu0 }
  0xea   : > { %v566_v23 = vmax.f32 %v550_v14, 0.0  ;;  %v556_v24 = vmax.f32 %v540_v15, 0.0  ;;  %v551_v25 = vadd.f32 %v752_v21, %v727_v9  ;;  %v541_v26 = vadd.f32 %v727_v9, %v422_v22  ;;  %v454_v27 = vpop.f32.mrb[3].mxu1 }
  0xeb   : > { %574 = vst [vmem:[%s874_s28 + $0x10] sm:$0xff] %v558_v18  ;;  %v564_v28 = vmax.f32 %v548_v19, 0.0  ;;  %v559_v29 = vmax.f32 %v543_v20, 0.0  ;;  %v549_v30 = vadd.f32 %v727_v9, %v454_v27 }
  0xec   : > { %582 = vst [vmem:[%s874_s28 + $0x50] sm:$0xff] %v566_v23  ;;  %572 = vst [vmem:[%s874_s28] sm:$0xff] %v556_v24  ;;  %v567_v31 = vmax.f32 %v551_v25, 0.0  ;;  %v557_v32 = vmax.f32 %v541_v26, 0.0 }
  0xed   : > { %580 = vst [vmem:[%s874_s28 + $0x40] sm:$0xff] %v564_v28  ;;  %575 = vst [vmem:[%s874_s28 + $0x18] sm:$0xff] %v559_v29  ;;  %v565_v33 = vmax.f32 %v549_v30, 0.0 }
  0xee   : > { %583 = vst [vmem:[%s874_s28 + $0x58] sm:$0xff] %v567_v31  ;;  %573 = vst [vmem:[%s874_s28 + $0x8] sm:$0xff] %v557_v32  ;;  %v747_v34 = vpop.f32.mrb[4].mxu0 }
  0xef   : > { %581 = vst [vmem:[%s874_s28 + $0x48] sm:$0xff] %v565_v33  ;;  %v546_v35 = vadd.f32 %v747_v34, %v727_v9  ;;  %v755_v36 = vpop.f32.mrb[4].mxu1  ;;  %v435_v37 = vpop.f32.mrb[5].mxu0 }
  0xf0   : > { %v554_v38 = vadd.f32 %v755_v36, %v727_v9  ;;  %v544_v39 = vadd.f32 %v727_v9, %v435_v37  ;;  %v467_v40 = vpop.f32.mrb[5].mxu1  ;;  %v748_v41 = vpop.f32.mrb[6].mxu0 }
  0xf1   : > { %v562_v42 = vmax.f32 %v546_v35, 0.0  ;;  %v552_v43 = vadd.f32 %v727_v9, %v467_v40  ;;  %v547_v44 = vadd.f32 %v748_v41, %v727_v9  ;;  %v756_v45 = vpop.f32.mrb[6].mxu1  ;;  %v438_v46 = vpop.f32.mrb[7].mxu0 }
  0xf2   : > { %v570_v47 = vmax.f32 %v554_v38, 0.0  ;;  %v560_v48 = vmax.f32 %v544_v39, 0.0  ;;  %v555_v49 = vadd.f32 %v756_v45, %v727_v9  ;;  %v545_v50 = vadd.f32 %v727_v9, %v438_v46  ;;  %v470_v51 = vpop.f32.mrb[7].mxu1 }
  0xf3   : > { %578 = vst [vmem:[%s874_s28 + $0x30] sm:$0xff] %v562_v42  ;;  %v568_v52 = vmax.f32 %v552_v43, 0.0  ;;  %v563_v53 = vmax.f32 %v547_v44, 0.0  ;;  %v553_v54 = vadd.f32 %v727_v9, %v470_v51 }
  0xf4   : > { %586 = vst [vmem:[%s874_s28 + $0x70] sm:$0xff] %v570_v47  ;;  %576 = vst [vmem:[%s874_s28 + $0x20] sm:$0xff] %v560_v48  ;;  %v571_v55 = vmax.f32 %v555_v49, 0.0  ;;  %v561_v56 = vmax.f32 %v545_v50, 0.0 }
  0xf5   : > { %584 = vst [vmem:[%s874_s28 + $0x60] sm:$0xff] %v568_v52  ;;  %579 = vst [vmem:[%s874_s28 + $0x38] sm:$0xff] %v563_v53  ;;  %v569_v57 = vmax.f32 %v553_v54, 0.0 }
  0xf6   : > { %587 = vst [vmem:[%s874_s28 + $0x78] sm:$0xff] %v571_v55  ;;  %577 = vst [vmem:[%s874_s28 + $0x28] sm:$0xff] %v561_v56 }
  0xf7   : > { %585 = vst [vmem:[%s874_s28 + $0x68] sm:$0xff] %v569_v57 }
  0xf8 PF: > { %s13_s14 = sadd.s32 1, %s814_s14   ;;  %s905_s12 = smov %s810_s13 }
  0xf9   : > { %p10_p5 = scmp.ge.s32.totalorder %s13_s14, 6   ;;  %s906_s13 = smov %s908_s15 }
  0xfb   :  { %12 = sbr.rel (!%p10_p5) target bundleno = 2 (0x2), region = 76 }

// kernel: inception_branch_forward.4
= control target key start
LH: loop header
LB: loop body
LE: loop exit
PB: predicated region body
PF: predicated region fallthrough
CT: control target
= control target key end

     0   :  { %s911_s12 = smov 0   ;;  %s913_s13 = smov 0   ;;  %s1005_s0 = inlined_call_operand.vmem [shape: bf16[512,96], index: 0, kind: input, shape index: {}]   ;;  %s1006_s1 = inlined_call_operand.vmem [shape: bf16[96,128], index: 1, kind: input, shape index: {}]   ;;  %s1007_s2 = inlined_call_operand.vmem [shape: f32[1,128], index: 2, kind: input, shape index: {}]   ;;  %s1008_s3 = inlined_call_operand.vmem [shape: f32[512,128], index: 3, kind: output, shape index: {}]  }
   0x1   :  { %s915_s14 = smov 0  }
   0x2 LB: > { %s32_s15 = sadd.s32 1, %s885_s13  ;;  %p745_p0 = scmp.ge.s32.totalorder %s889_s14, 1  ;;  %s889_s14 = sphi %s915_s14, %s13_s14   ;;  %s885_s13 = sphi %s913_s13, %s1010_s13   ;;  %s881_s12 = sphi %s911_s12, %s1009_s12  }
   0x3   : > { %p34_p1 = scmp.ge.s32.totalorder %s32_s15, 4  ;;  %p188_p2 = scmp.lt.s32.totalorder %s889_s14, 5 }
   0x5   : > { %s1012_s15 = smov (%p34_p1, %s32_s15), 0  ;;  %p189_p3 = pnand %p745_p0, %p188_p2 }
   0x6   : > { %v853_v0 = vld [vmem:[%s1006_s1] sm:$0xff] (!%p189_p3)   ;;  %s746_s18 = sshll.u32 (!%p189_p3), %s881_s12, 4  ;;  %v854_v1 = vld [vmem:[%s1006_s1 + $0x8] sm:$0xff] (!%p189_p3)   ;;  %v855_v2 = vld [vmem:[%s1006_s1 + $0x10] sm:$0xff] (!%p189_p3)   ;;  %vm400_vm0 = vcmask (!%p189_p3), 785408  }
   0x7   : > { %192 = sbr.rel (%p189_p3) target bundleno = 259 (0x103), region = 32  ;;  %p230_p4 = scmp.lt.s32.totalorder (!%p189_p3), %s746_s18, 63  ;;  %789 = vmatprep.subr.bf16.mxu0 (!%p189_p3), %v853_v0  ;;  %817 = vmatprep.subr.bf16.mxu1 (!%p189_p3), %v853_v0  ;;  %v856_v3 = vld [vmem:[%s1006_s1 + $0x18] sm:$0xff] (!%p189_p3)   ;;  %v857_v6 = vld [vmem:[%s1006_s1 + $0x20] sm:$0xff] (!%p189_p3)   ;;  %v858_v7 = vld [vmem:[%s1006_s1 + $0x28] sm:$0xff] (!%p189_p3)  }
   0x8   : > { %790 = vmatpush3.bf16.msra.mxu0 (!%p189_p3), %v853_v0  ;;  %823 = vmatpush3.bf16.msra.mxu1 (!%p189_p3), %v853_v0  ;;  %v772_v14 = vld [vmem:[%s1007_s2] ss:$0 sm:$0xff] (!%p189_p3) }
   0x9   : > { %791 = vmatprep.subr.bf16.mxu0 (!%p189_p3), %v854_v1  ;;  %818 = vmatprep.subr.bf16.mxu1 (!%p189_p3), %v854_v1 }
   0xc   : > { %792 = vmatpush3.bf16.msra.mxu0 (!%p189_p3), %v854_v1  ;;  %824 = vmatpush3.bf16.msra.mxu1 (!%p189_p3), %v854_v1 }
   0xd   : > { %793 = vmatprep.subr.bf16.mxu0 (!%p189_p3), %v855_v2  ;;  %819 = vmatprep.subr.bf16.mxu1 (!%p189_p3), %v855_v2 }
   0xe   : > { %s1014_s18 = smov (!%p230_p4, %s746_s18), 63 }
   0xf   : > { %s747_s23 = sshll.u32 %s1014_s18, 2  ;;  %s749_s8 = sshll.u32 %s1014_s18, 3 }
  0x10   : > { %s947_s28 = scalar_lea.vmem %s1005_s0, %s747_s23  ;;  %794 = vmatpush3.bf16.msra.mxu0 %v855_v2  ;;  %825 = vmatpush3.bf16.msra.mxu1 %v855_v2  ;;  %s978_s11 = scalar_lea.vmem %s1008_s3, %s749_s8 }
  0x11   : > { %v859_v4 = vld [vmem:[%s947_s28] sm:$0xff]   ;;  %795 = vmatprep.subr.bf16.mxu0 %v856_v3  ;;  %820 = vmatprep.subr.bf16.mxu1 %v856_v3  ;;  %v861_v8 = vld [vmem:[%s947_s28 + $0x8] sm:$0xff]   ;;  %v863_v10 = vld [vmem:[%s947_s28 + $0x10] sm:$0xff]  }
  0x12   : > { %v860_v5 = vld [vmem:[%s947_s28 + $0x20] sm:$0xff]   ;;  %801 = vmatprep.mubr.msk.bf16.mxu0 %vm400_vm0, %v859_v4  ;;  %v862_v9 = vld [vmem:[%s947_s28 + $0x28] sm:$0xff]   ;;  %v864_v11 = vld [vmem:[%s947_s28 + $0x30] sm:$0xff]  }
  0x13   : > { %809 = vmatprep.mubr.msk.bf16.mxu1 %vm400_vm0, %v860_v5  ;;  %v865_v12 = vld [vmem:[%s947_s28 + $0x18] sm:$0xff]  }
  0x14   : > { %796 = vmatpush3.bf16.msra.mxu0 %v856_v3  ;;  %826 = vmatpush3.bf16.msra.mxu1 %v856_v3  ;;  %v866_v13 = vld [vmem:[%s947_s28 + $0x38] sm:$0xff]  }
  0x15   : > { %797 = vmatprep.subr.bf16.mxu0 %v857_v6  ;;  %821 = vmatprep.subr.bf16.mxu1 %v857_v6 }
  0x18   : > { %798 = vmatpush3.bf16.msra.mxu0 %v857_v6  ;;  %827 = vmatpush3.bf16.msra.mxu1 %v857_v6 }
  0x19   : > { %799 = vmatprep.subr.bf16.mxu0 %v858_v7  ;;  %822 = vmatprep.subr.bf16.mxu1 %v858_v7 }
  0x1c   : > { %800 = vmatpush3.bf16.msra.mxu0 %v858_v7  ;;  %828 = vmatpush3.bf16.msra.mxu1 %v858_v7 }
  0x1f   : > { %802 = vmatmul.mubr.msk.bf16.vlgmr.msra.gmra.mrb[0].mxu0 %vm400_vm0, %v861_v8  ;;  %810 = vmatmul.mubr.msk.bf16.vlgmr.msra.gmra.mrb[0].mxu1 %vm400_vm0, %v862_v9 }
  0x20   : > { %805 = vmatprep.mubr.msk.bf16.mxu0 %vm400_vm0, %v863_v10  ;;  %813 = vmatprep.mubr.msk.bf16.mxu1 %vm400_vm0, %v864_v11 }
  0x27   : > { %806 = vmatmul.mubr.msk.bf16.gmra.mrb[4].mxu0 %vm400_vm0, %v865_v12  ;;  %814 = vmatmul.mubr.msk.bf16.gmra.mrb[4].mxu1 %vm400_vm0, %v866_v13 }
  0xf2   : > { %v803_v15 = vpop.f32.mrb[0].mxu0  ;;  %v811_v16 = vpop.f32.mrb[0].mxu1 }
  0xf3   : > { %v582_v17 = vadd.f32 %v803_v15, %v772_v14  ;;  %v590_v18 = vadd.f32 %v811_v16, %v772_v14  ;;  %v459_v19 = vpop.f32.mrb[1].mxu0  ;;  %v491_v20 = vpop.f32.mrb[1].mxu1 }
  0xf4   : > { %v580_v21 = vadd.f32 %v772_v14, %v459_v19  ;;  %v588_v22 = vadd.f32 %v772_v14, %v491_v20  ;;  %v804_v23 = vpop.f32.mrb[2].mxu0  ;;  %v812_v24 = vpop.f32.mrb[2].mxu1 }
  0xf5   : > { %v598_v25 = vmax.f32 %v582_v17, 0.0  ;;  %v606_v26 = vmax.f32 %v590_v18, 0.0  ;;  %v583_v27 = vadd.f32 %v804_v23, %v772_v14  ;;  %v591_v28 = vadd.f32 %v812_v24, %v772_v14  ;;  %v462_v29 = vpop.f32.mrb[3].mxu0  ;;  %v494_v30 = vpop.f32.mrb[3].mxu1 }
  0xf6   : > { %v596_v31 = vmax.f32 %v580_v21, 0.0  ;;  %v604_v32 = vmax.f32 %v588_v22, 0.0  ;;  %v581_v33 = vadd.f32 %v772_v14, %v462_v29  ;;  %v589_v34 = vadd.f32 %v772_v14, %v494_v30 }
  0xf7   : > { %614 = vst [vmem:[%s978_s11 + $0x10] sm:$0xff] %v598_v25  ;;  %622 = vst [vmem:[%s978_s11 + $0x50] sm:$0xff] %v606_v26  ;;  %v599_v35 = vmax.f32 %v583_v27, 0.0  ;;  %v607_v36 = vmax.f32 %v591_v28, 0.0 }
  0xf8   : > { %612 = vst [vmem:[%s978_s11] sm:$0xff] %v596_v31  ;;  %620 = vst [vmem:[%s978_s11 + $0x40] sm:$0xff] %v604_v32  ;;  %v597_v37 = vmax.f32 %v581_v33, 0.0  ;;  %v605_v38 = vmax.f32 %v589_v34, 0.0 }
  0xf9   : > { %615 = vst [vmem:[%s978_s11 + $0x18] sm:$0xff] %v599_v35  ;;  %623 = vst [vmem:[%s978_s11 + $0x58] sm:$0xff] %v607_v36 }
  0xfa   : > { %613 = vst [vmem:[%s978_s11 + $0x8] sm:$0xff] %v597_v37  ;;  %621 = vst [vmem:[%s978_s11 + $0x48] sm:$0xff] %v605_v38  ;;  %v807_v39 = vpop.f32.mrb[4].mxu0  ;;  %v815_v40 = vpop.f32.mrb[4].mxu1 }
  0xfb   : > { %v586_v41 = vadd.f32 %v807_v39, %v772_v14  ;;  %v594_v42 = vadd.f32 %v815_v40, %v772_v14  ;;  %v475_v43 = vpop.f32.mrb[5].mxu0  ;;  %v507_v44 = vpop.f32.mrb[5].mxu1 }
  0xfc   : > { %v584_v45 = vadd.f32 %v772_v14, %v475_v43  ;;  %v592_v46 = vadd.f32 %v772_v14, %v507_v44  ;;  %v808_v47 = vpop.f32.mrb[6].mxu0  ;;  %v816_v48 = vpop.f32.mrb[6].mxu1 }
  0xfd   : > { %v602_v49 = vmax.f32 %v586_v41, 0.0  ;;  %v610_v50 = vmax.f32 %v594_v42, 0.0  ;;  %v587_v51 = vadd.f32 %v808_v47, %v772_v14  ;;  %v595_v52 = vadd.f32 %v816_v48, %v772_v14  ;;  %v478_v53 = vpop.f32.mrb[7].mxu0  ;;  %v510_v54 = vpop.f32.mrb[7].mxu1 }
  0xfe   : > { %v600_v55 = vmax.f32 %v584_v45, 0.0  ;;  %v608_v56 = vmax.f32 %v592_v46, 0.0  ;;  %v585_v57 = vadd.f32 %v772_v14, %v478_v53  ;;  %v593_v58 = vadd.f32 %v772_v14, %v510_v54 }
  0xff   : > { %618 = vst [vmem:[%s978_s11 + $0x30] sm:$0xff] %v602_v49  ;;  %626 = vst [vmem:[%s978_s11 + $0x70] sm:$0xff] %v610_v50  ;;  %v603_v59 = vmax.f32 %v587_v51, 0.0  ;;  %v611_v60 = vmax.f32 %v595_v52, 0.0 }
 0x100   : > { %616 = vst [vmem:[%s978_s11 + $0x20] sm:$0xff] %v600_v55  ;;  %624 = vst [vmem:[%s978_s11 + $0x60] sm:$0xff] %v608_v56  ;;  %v601_v61 = vmax.f32 %v585_v57, 0.0  ;;  %v609_v62 = vmax.f32 %v593_v58, 0.0 }
 0x101   : > { %619 = vst [vmem:[%s978_s11 + $0x38] sm:$0xff] %v603_v59  ;;  %627 = vst [vmem:[%s978_s11 + $0x78] sm:$0xff] %v611_v60 }
 0x102   : > { %617 = vst [vmem:[%s978_s11 + $0x28] sm:$0xff] %v601_v61  ;;  %625 = vst [vmem:[%s978_s11 + $0x68] sm:$0xff] %v609_v62 }
 0x103 PF: > { %s13_s14 = sadd.s32 1, %s889_s14   ;;  %s1009_s12 = smov %s885_s13 }
 0x104   : > { %p10_p5 = scmp.ge.s32.totalorder %s13_s14, 6   ;;  %s1010_s13 = smov %s1012_s15 }
 0x106   :  { %12 = sbr.rel (!%p10_p5) target bundleno = 2 (0x2), region = 76 }

// kernel: inception_branch_forward.5
= control target key start
LH: loop header
LB: loop body
LE: loop exit
PB: predicated region body
PF: predicated region fallthrough
CT: control target
= control target key end

     0   :  { %8 = vsyncpa [#allocation4], 0  ;;  %s1186_s0 = inlined_call_operand.vmem [shape: bf16[512,96], index: 0, kind: input, shape index: {}]   ;;  %s1187_s1 = inlined_call_operand.vmem [shape: bf16[96,128], index: 1, kind: input, shape index: {}]   ;;  %s1188_s2 = inlined_call_operand.vmem [shape: f32[1,128], index: 2, kind: input, shape index: {}]   ;;  %s1189_s3 = inlined_call_operand.hbm [shape: f32[512,128], index: 3, kind: output, shape index: {}]  }
   0x1   :  { %10 = vsyncpa [#allocation4 + $0x1], 0  ;;  %s1010_s12 = smov 0   ;;  %s1012_s13 = smov 0  }
   0x2   :  { %s1014_s14 = smov 0   ;;  %s1016_s15 = smov 0  }
   0x3   :  { %s1018_s16 = smov 0   ;;  %s1020_s17 = smov 0  }
   0x4 LB: > { %s743_s18 = sadd.s32 4294967295, %s985_s17   ;;  %s744_s19 = sadd.s32 4294967294, %s985_s17   ;;  %s985_s17 = sphi %s1020_s17, %s16_s17   ;;  %s981_s16 = sphi %s1018_s16, %s1196_s16   ;;  %s977_s15 = sphi %s1016_s15, %s1195_s15   ;;  %s973_s14 = sphi %s1014_s14, %s1194_s14   ;;  %s969_s13 = sphi %s1012_s13, %s1193_s13   ;;  %s965_s12 = sphi %s1010_s12, %s1192_s12  }
   0x5   : > { %s35_s20 = sadd.s32 1, %s981_s16  ;;  %s126_s21 = sadd.s32 1, %s973_s14 }
   0x6   : > { %p37_p0 = scmp.ge.s32.totalorder %s35_s20, 4  ;;  %p136_p1 = scmp.ne.s32.totalorder %s973_s14, %s969_s13 }
   0x7   : > { %p137_p2 = scmp.eq.s32.totalorder %s743_s18, 3  ;;  %p142_p3 = scmp.ne.s32.totalorder %s969_s13, %s965_s12 }
   0x8   : > { %s1198_s20 = smov (%p37_p0, %s35_s20), 0  ;;  %p143_p5 = scmp.eq.s32.totalorder %s744_s19, 3 }
   0x9   : > { %p1050_p4 = por %p137_p2, %p136_p1  ;;  %s121_s23 = ssub.s32 %s981_s16, %s1198_s20 }
   0xa   : > { %p749_p6 = scmp.ge.s32.totalorder %s985_s17, 1  ;;  %p124_p7 = scmp.eq.s32.totalorder %s121_s23, 0 }
   0xb   : > { %p1057_p8 = por %p143_p5, %p142_p3  ;;  %p191_p9 = scmp.lt.s32.totalorder %s985_s17, 5 }
   0xc   : > { %s1063_s25 = scalar_select %p124_p7, %s973_s14, %s126_s21  }
   0xd   : > { %p192_p10 = pnand %p749_p6, %p191_p9 }
   0xe   : > { %v893_v0 = vld [vmem:[%s1187_s1] sm:$0xff] (!%p192_p10)   ;;  %s751_s28 = sshll.u32 (!%p192_p10), %s977_s15, 4  ;;  %v894_v1 = vld [vmem:[%s1187_s1 + $0x8] sm:$0xff] (!%p192_p10)   ;;  %v895_v2 = vld [vmem:[%s1187_s1 + $0x10] sm:$0xff] (!%p192_p10)   ;;  %vm392_vm0 = vcmask (!%p192_p10), 785408   ;;  %s226_s26 = sand.u32 (!%p192_p10), 1, %s969_s13  }
   0xf   : > { %195 = sbr.rel (%p192_p10) target bundleno = 281 (0x119), region = 32  ;;  %p230_p11 = scmp.lt.s32.totalorder (!%p192_p10), %s751_s28, 63  ;;  %796 = vmatprep.subr.bf16.mxu0 (!%p192_p10), %v893_v0  ;;  %824 = vmatprep.subr.bf16.mxu1 (!%p192_p10), %v893_v0  ;;  %v896_v3 = vld [vmem:[%s1187_s1 + $0x18] sm:$0xff] (!%p192_p10)   ;;  %v897_v6 = vld [vmem:[%s1187_s1 + $0x20] sm:$0xff] (!%p192_p10)   ;;  %v898_v7 = vld [vmem:[%s1187_s1 + $0x28] sm:$0xff] (!%p192_p10)  }
  0x10   : > { %797 = vmatpush3.bf16.msra.mxu0 (!%p192_p10), %v893_v0  ;;  %830 = vmatpush3.bf16.msra.mxu1 (!%p192_p10), %v893_v0  ;;  %v775_v14 = vld [vmem:[%s1188_s2] ss:$0 sm:$0xff] (!%p192_p10)  ;;  %s750_s29 = sshll.u32 (!%p192_p10), %s226_s26, 7  ;;  %s781_s4 = sshll.u32 (!%p192_p10), %s977_s15, 11 }
  0x11   : > { %798 = vmatprep.subr.bf16.mxu0 (!%p192_p10), %v894_v1  ;;  %825 = vmatprep.subr.bf16.mxu1 (!%p192_p10), %v894_v1  ;;  %s1111_s30 = scalar_lea.vmem (!%p192_p10), [#allocation3], %s750_s29  ;;  %s1128_s7 = scalar_lea.hbm (!%p192_p10), %s1189_s3, %s781_s4 }
  0x12   : > { %s635_s5 = sshll.u32 (!%p192_p10), %s1111_s30, 4  ;;  %s1140_s8 = scalar_lea.sflag (!%p192_p10), [#allocation4], %s226_s26  ;;  %s1130_s5 = int_to_ptr.vmem [resolvable:$true] %s635_s5 }
  0x13   : > { %s907_s9 = scalar_lea.vmem (!%p192_p10), %s1130_s5, 2048  ;;  %s987_s10 = smov (!%p192_p10), [#allocation3]  }
  0x14   : > { %799 = vmatpush3.bf16.msra.mxu0 (!%p192_p10), %v894_v1  ;;  %831 = vmatpush3.bf16.msra.mxu1 (!%p192_p10), %v894_v1  ;;  %p908_p12 = scmp.ne.s32.totalorder (!%p192_p10), %s1130_s5, %s907_s9 }
  0x15   : > { %800 = vmatprep.subr.bf16.mxu0 (!%p192_p10), %v895_v2  ;;  %826 = vmatprep.subr.bf16.mxu1 (!%p192_p10), %v895_v2 }
  0x16   : > { %s1200_s28 = smov (!%p230_p11, %s751_s28), 63  ;;  %p909_p13 = pnand %p908_p12, %p1050_p4 }
  0x17   : > { %s752_s6 = sshll.u32 %s1200_s28, 2 }
  0x18   : > { %s1081_s11 = scalar_lea.vmem %s1186_s0, %s752_s6  ;;  %801 = vmatpush3.bf16.msra.mxu0 %v895_v2  ;;  %832 = vmatpush3.bf16.msra.mxu1 %v895_v2  ;;  %p910_p0 = pneg %p909_p13 }
  0x19   : > { %v899_v4 = vld [vmem:[%s1081_s11] sm:$0xff]   ;;  %802 = vmatprep.subr.bf16.mxu0 %v896_v3  ;;  %827 = vmatprep.subr.bf16.mxu1 %v896_v3  ;;  %v901_v8 = vld [vmem:[%s1081_s11 + $0x8] sm:$0xff]   ;;  %v903_v10 = vld [vmem:[%s1081_s11 + $0x10] sm:$0xff]  }
  0x1a   : > { %v900_v5 = vld [vmem:[%s1081_s11 + $0x20] sm:$0xff]   ;;  %808 = vmatprep.mubr.msk.bf16.mxu0 %vm392_vm0, %v899_v4  ;;  %v902_v9 = vld [vmem:[%s1081_s11 + $0x28] sm:$0xff]   ;;  %v904_v11 = vld [vmem:[%s1081_s11 + $0x30] sm:$0xff]  }
  0x1b   : > { %816 = vmatprep.mubr.msk.bf16.mxu1 %vm392_vm0, %v900_v5  ;;  %v905_v12 = vld [vmem:[%s1081_s11 + $0x18] sm:$0xff]  }
  0x1c   : > { %803 = vmatpush3.bf16.msra.mxu0 %v896_v3  ;;  %833 = vmatpush3.bf16.msra.mxu1 %v896_v3  ;;  %v906_v13 = vld [vmem:[%s1081_s11 + $0x38] sm:$0xff]   ;;  %s911_s11 = sshll.u32 %s987_s10, 4  ;;  %s912_s11 = int_to_ptr.vmem [resolvable:$false] %s911_s11 }
  0x1d   : > { %804 = vmatprep.subr.bf16.mxu0 %v897_v6  ;;  %828 = vmatprep.subr.bf16.mxu1 %v897_v6  ;;  %s913_s18 = scalar_lea.vmem %s912_s11, 4096  ;;  %p914_p1 = scmp.lt.s32.totalorder %s1130_s5, %s912_s11 }
  0x1e   : > { %p915_p2 = scmp.lt.s32.totalorder %s913_s18, %s907_s9 }
  0x20   : > { %805 = vmatpush3.bf16.msra.mxu0 %v897_v6  ;;  %834 = vmatpush3.bf16.msra.mxu1 %v897_v6  ;;  %p916_p3 = por %p915_p2, %p914_p1 }
  0x21   : > { %806 = vmatprep.subr.bf16.mxu0 %v898_v7  ;;  %829 = vmatprep.subr.bf16.mxu1 %v898_v7 }
  0x22   : > { %p917_p5 = pnand %p916_p3, %p910_p0 }
  0x24   : > { %807 = vmatpush3.bf16.msra.mxu0 %v898_v7  ;;  %835 = vmatpush3.bf16.msra.mxu1 %v898_v7 }
  0x27   : > { %809 = vmatmul.mubr.msk.bf16.vlgmr.msra.gmra.mrb[0].mxu0 %vm392_vm0, %v901_v8  ;;  %817 = vmatmul.mubr.msk.bf16.vlgmr.msra.gmra.mrb[0].mxu1 %vm392_vm0, %v902_v9 }
  0x28   : > { %812 = vmatprep.mubr.msk.bf16.mxu0 %vm392_vm0, %v903_v10  ;;  %820 = vmatprep.mubr.msk.bf16.mxu1 %vm392_vm0, %v904_v11 }
  0x2f   : > { %813 = vmatmul.mubr.msk.bf16.gmra.mrb[4].mxu0 %vm392_vm0, %v905_v12  ;;  %821 = vmatmul.mubr.msk.bf16.gmra.mrb[4].mxu1 %vm392_vm0, %v906_v13 }
  0xfa   : > { %v810_v15 = vpop.f32.mrb[0].mxu0  ;;  %v818_v16 = vpop.f32.mrb[0].mxu1 }
  0xfb   : > { %v574_v17 = vadd.f32 %v810_v15, %v775_v14  ;;  %v582_v18 = vadd.f32 %v818_v16, %v775_v14  ;;  %v451_v19 = vpop.f32.mrb[1].mxu0  ;;  %v483_v20 = vpop.f32.mrb[1].mxu1 }
  0xfc   : > { %v572_v21 = vadd.f32 %v775_v14, %v451_v19  ;;  %v580_v22 = vadd.f32 %v775_v14, %v483_v20  ;;  %v811_v23 = vpop.f32.mrb[2].mxu0  ;;  %v819_v24 = vpop.f32.mrb[2].mxu1 }
  0xfd   : > { %v590_v25 = vmax.f32 %v574_v17, 0.0  ;;  %v598_v26 = vmax.f32 %v582_v18, 0.0  ;;  %v575_v27 = vadd.f32 %v811_v23, %v775_v14  ;;  %v583_v28 = vadd.f32 %v819_v24, %v775_v14  ;;  %v454_v29 = vpop.f32.mrb[3].mxu0  ;;  %v486_v30 = vpop.f32.mrb[3].mxu1 }
  0xfe   : > { %v588_v31 = vmax.f32 %v572_v21, 0.0  ;;  %v596_v32 = vmax.f32 %v580_v22, 0.0  ;;  %v573_v33 = vadd.f32 %v775_v14, %v454_v29  ;;  %v581_v34 = vadd.f32 %v775_v14, %v486_v30 }
  0xff   : > { %606 = vst [vmem:[%s1111_s30 + $0x10] sm:$0xff] %v590_v25  ;;  %614 = vst [vmem:[%s1111_s30 + $0x50] sm:$0xff] %v598_v26  ;;  %v591_v35 = vmax.f32 %v575_v27, 0.0  ;;  %v599_v36 = vmax.f32 %v583_v28, 0.0 }
 0x100   : > { %604 = vst [vmem:[%s1111_s30] sm:$0xff] %v588_v31  ;;  %612 = vst [vmem:[%s1111_s30 + $0x40] sm:$0xff] %v596_v32  ;;  %v589_v37 = vmax.f32 %v573_v33, 0.0  ;;  %v597_v38 = vmax.f32 %v581_v34, 0.0 }
 0x101   : > { %607 = vst [vmem:[%s1111_s30 + $0x18] sm:$0xff] %v591_v35  ;;  %615 = vst [vmem:[%s1111_s30 + $0x58] sm:$0xff] %v599_v36 }
 0x102   : > { %605 = vst [vmem:[%s1111_s30 + $0x8] sm:$0xff] %v589_v37  ;;  %613 = vst [vmem:[%s1111_s30 + $0x48] sm:$0xff] %v597_v38  ;;  %v814_v39 = vpop.f32.mrb[4].mxu0  ;;  %v822_v40 = vpop.f32.mrb[4].mxu1 }
 0x103   : > { %v578_v41 = vadd.f32 %v814_v39, %v775_v14  ;;  %v586_v42 = vadd.f32 %v822_v40, %v775_v14  ;;  %v467_v43 = vpop.f32.mrb[5].mxu0  ;;  %v499_v44 = vpop.f32.mrb[5].mxu1 }
 0x104   : > { %v576_v45 = vadd.f32 %v775_v14, %v467_v43  ;;  %v584_v46 = vadd.f32 %v775_v14, %v499_v44  ;;  %v815_v47 = vpop.f32.mrb[6].mxu0  ;;  %v823_v48 = vpop.f32.mrb[6].mxu1 }
 0x105   : > { %v594_v49 = vmax.f32 %v578_v41, 0.0  ;;  %v602_v50 = vmax.f32 %v586_v42, 0.0  ;;  %v579_v51 = vadd.f32 %v815_v47, %v775_v14  ;;  %v587_v52 = vadd.f32 %v823_v48, %v775_v14  ;;  %v470_v53 = vpop.f32.mrb[7].mxu0  ;;  %v502_v54 = vpop.f32.mrb[7].mxu1 }
 0x106   : > { %v592_v55 = vmax.f32 %v576_v45, 0.0  ;;  %v600_v56 = vmax.f32 %v584_v46, 0.0  ;;  %v577_v57 = vadd.f32 %v775_v14, %v470_v53  ;;  %v585_v58 = vadd.f32 %v775_v14, %v502_v54 }
 0x107   : > { %610 = vst [vmem:[%s1111_s30 + $0x30] sm:$0xff] %v594_v49  ;;  %618 = vst [vmem:[%s1111_s30 + $0x70] sm:$0xff] %v602_v50  ;;  %v595_v59 = vmax.f32 %v579_v51, 0.0  ;;  %v603_v60 = vmax.f32 %v587_v52, 0.0 }
 0x108   : > { %608 = vst [vmem:[%s1111_s30 + $0x20] sm:$0xff] %v592_v55  ;;  %616 = vst [vmem:[%s1111_s30 + $0x60] sm:$0xff] %v600_v56  ;;  %v593_v61 = vmax.f32 %v577_v57, 0.0  ;;  %v601_v62 = vmax.f32 %v585_v58, 0.0 }
 0x109   : > { %611 = vst [vmem:[%s1111_s30 + $0x38] sm:$0xff] %v595_v59  ;;  %619 = vst [vmem:[%s1111_s30 + $0x78] sm:$0xff] %v603_v60 }
 0x10a   : > { %609 = vst [vmem:[%s1111_s30 + $0x28] sm:$0xff] %v593_v61  ;;  %617 = vst [vmem:[%s1111_s30 + $0x68] sm:$0xff] %v601_v62 }
 0x10b   : > { %920 = shalt.err (!%p917_p5)
}
 0x10c   : > { %s921_s19 = scalar_lea.hbm %s1128_s7, 2048  ;;  %s925_s26 = scalar_lea.hbm %s1189_s3, 8192 }
 0x10d   : > { %p922_p6 = scmp.ne.s32.totalorder %s1128_s7, %s921_s19  ;;  %p926_p10 = scmp.lt.u32.totalorder %s1128_s7, %s1189_s3 }
 0x10e   : > { %p927_p11 = scmp.lt.u32.totalorder %s925_s26, %s921_s19  ;;  %p929_p13 = scmp.lt.u32.totalorder %s921_s19, %s1128_s7 }
 0x10f   : > { %p923_p7 = pnand %p922_p6, %p1050_p4 }
 0x110   : > { %p928_p12 = por %p927_p11, %p926_p10 }
 0x111   : > { %p924_p9 = pneg %p923_p7 }
 0x112   : > { %p930_p0 = por %p929_p13, %p928_p12 }
 0x114   : > { %p931_p1 = pnand %p930_p0, %p924_p9 }
 0x116   : > { %934 = shalt.err (!%p931_p1)
}
 0x117   : > { %s988_s29 = smov 128   ;;  %s989_s30 = smov 8  }
 0x118   : > { %836 = dma.vmem_to_hbm [thread:$0]  (%p1050_p4), %s1130_s5, 2048, %s1128_s7, %s1140_s8, %s988_s29, %s988_s29, %s989_s30  }
 0x119 PF: > { %p842_p2 = scmp.ge.s32.totalorder %s985_s17, 2  ;;  %s650_s4 = sand.u32 1, %s965_s12  }
 0x11a   : > { %s651_s15 = scalar_lea.sflag [#allocation4], %s650_s4 }
 0x11b   : > { %p839_p3 = pnand %p842_p2, %p1057_p8 }
 0x11d   : > { %960 = dma.done.wait (!%p839_p3), %s651_s15, 2048  }
 0x11e   : > { %962 = vsyncadd (!%p839_p3), %s651_s15, 4294965248  ;;  %s16_s17 = sadd.s32 1, %s985_s17   ;;  %s1192_s12 = smov %s969_s13 }
 0x11f   : > { %p13_p5 = scmp.ge.s32.totalorder %s16_s17, 6   ;;  %s1193_s13 = smov %s973_s14 }
 0x120   : > { %s1194_s14 = smov %s1063_s25  ;;  %s1195_s15 = smov %s981_s16 }
 0x121   : > { %s1196_s16 = smov %s1198_s20  ;;  %15 = sbr.rel (!%p13_p5) target bundleno = 4 (0x4), region = 81 }
 0x128   :  { %656 = vsyncpa [#allocation4], 1 }
 0x129   :  { %658 = vsyncpa [#allocation4 + $0x1], 1 }

</bundles_post_ra>
